<compile_context>
chip_gen: v5e
topology: v5e:2x2
jax: 0.10.0
libtpu: 0.0.40
codegen_flags: <defaults>
</compile_context>

<pallas_src>
import jax
import jax.numpy as jnp
from jax.experimental import pallas as pl
from jax.experimental.pallas import tpu as pltpu


def _convt_leaky_kernel(x_ref, w_ref, b_ref, o_ref):
    # x_ref: (Cin, t_hw) f32   w_ref: (Nout_pad, Cin) bf16
    # b_ref: (Nout_pad, 1) f32 o_ref: (Nout_pad, t_hw) f32
    # In-kernel VPU cast of x to bf16 (free under DMA slack; halves nothing in
    # HBM but removes the wrapper-side cast dispatch + extra HBM round trip).
    x = x_ref[...].astype(jnp.bfloat16)
    acc = jnp.dot(w_ref[...], x, preferred_element_type=jnp.float32)
    acc = acc + b_ref[...]
    # where(t > 0, t, 0.5 * t)
    o_ref[...] = jnp.where(acc > 0, acc, acc * 0.5).astype(o_ref.dtype)


def _pick_tile(hw_pad):
    """Largest lane-aligned spatial tile <= 2048 that divides hw_pad."""
    cap = min(hw_pad, 2048)
    t = (cap // 128) * 128
    while hw_pad % t != 0:
        t -= 128
    return t


def conv_transpose_leaky(x_nchw, weight, bias, *, t_hw=None):
    """x_nchw: (N, Cin, H, W) f32; weight: (Cin, Cout, 2, 2); bias: (Cout,)."""
    N, Cin, H, W = x_nchw.shape
    _, Cout, KH, KW = weight.shape
    assert (KH, KW) == (2, 2)
    HW = H * W
    Nout = Cout * KH * KW          # 28
    Nout_pad = 32                  # pad to a clean sublane multiple

    # Input: NCHW -> (N, Cin, HW); pure reshape, NO cast (fused into kernel).
    x_flat = x_nchw.reshape(N, Cin, HW)

    # Pad the spatial (lane) axis to a multiple of 128 if needed.
    HW_pad = ((HW + 127) // 128) * 128
    if HW_pad != HW:
        x_flat = jnp.pad(x_flat, ((0, 0), (0, 0), (0, HW_pad - HW)))

    if t_hw is None:
        t_hw = _pick_tile(HW_pad)
    assert HW_pad % t_hw == 0 and t_hw % 128 == 0

    # Weight: (Cin, Cout, 2, 2) -> (Cin, Cout*4) -> (Cout*4, Cin), pad rows
    # to 32, cast once to bf16.  Row index = co*4 + kh*2 + kw.
    w_t = weight.reshape(Cin, Nout).T
    w_pad = (jnp.zeros((Nout_pad, Cin), jnp.bfloat16)
             .at[:Nout].set(w_t.astype(jnp.bfloat16)))

    # Bias: repeat per (kh, kw) tap, pad to 32, keep f32 for the accumulator.
    b_rep = jnp.repeat(bias.astype(jnp.float32), KH * KW)          # (28,)
    b_pad = jnp.zeros((Nout_pad, 1), jnp.float32).at[:Nout, 0].set(b_rep)

    grid = (N, HW_pad // t_hw)

    y = pl.pallas_call(
        _convt_leaky_kernel,
        out_shape=jax.ShapeDtypeStruct((N, Nout_pad, HW_pad), jnp.float32),
        grid=grid,
        in_specs=[
            # (Cin, t_hw) f32 slab per (batch, spatial-tile); batch squeezed.
            pl.BlockSpec((None, Cin, t_hw), lambda n, j: (n, 0, j)),
            # Weight and bias: constant index_map -> VMEM-resident.
            pl.BlockSpec((Nout_pad, Cin), lambda n, j: (0, 0)),
            pl.BlockSpec((Nout_pad, 1), lambda n, j: (0, 0)),
        ],
        out_specs=pl.BlockSpec((None, Nout_pad, t_hw), lambda n, j: (n, 0, j)),
        compiler_params=pltpu.CompilerParams(
            dimension_semantics=("parallel", "parallel")),
    )(x_flat, w_pad, b_pad)

    # (N, 32, HW_pad) -> drop padding -> (N, Cout, KH, KW, H, W)
    #                 -> (N, Cout, H, KH, W, KW) -> (N, Cout, 2H, 2W)
    # TODO(synk): for much larger spatial sizes, fold this interleave into the
    # kernel (lane-dense (Cout,4*t_hw) blocks in final order) to drop the
    # transpose dispatch.
    y = y[:, :Nout, :HW].reshape(N, Cout, KH, KW, H, W)
    y = jnp.transpose(y, (0, 1, 4, 2, 5, 3)).reshape(N, Cout, H * KH, W * KW)
    return y


def _reference(x, weight, bias):
    # Pure-JAX f32 reference of the same forward pass.
    N, Cin, H, W = x.shape
    _, Cout, KH, KW = weight.shape
    t = jnp.einsum('nchw,ckij->nkhiwj', x, weight)          # (N,Cout,H,KH,W,KW)
    t = t.reshape(N, Cout, H * KH, W * KW) + bias[None, :, None, None]
    return jnp.where(t > 0, t, t * 0.5)


if __name__ == "__main__":
    # Module-defined channel sizes (Cin=480, Cout=7); small batch / spatial.
    N, Cin, H, W = 2, 480, 16, 16
    Cout, K = 7, 2

    key = jax.random.PRNGKey(0)
    kx, kw, kb = jax.random.split(key, 3)
    x1 = jax.random.normal(kx, (N, Cin, H, W), dtype=jnp.float32)
    fan_in = Cin * K * K
    bound = 1.0 / (fan_in ** 0.5)
    weight = jax.random.uniform(kw, (Cin, Cout, K, K),
                                minval=-bound, maxval=bound, dtype=jnp.float32)
    bias = jax.random.uniform(kb, (Cout,), minval=-bound, maxval=bound,
                              dtype=jnp.float32)

    fwd = jax.jit(conv_transpose_leaky)
    out = fwd(x1, weight, bias)
    jax.block_until_ready(out)
    assert out.shape == (N, Cout, H * 2, W * 2), out.shape

    ref = _reference(x1, weight, bias)
    # bf16 operands with f32 accumulation over Cin=480 -> ~0.5% relative error.
    err = jnp.max(jnp.abs(out - ref))
    assert err < 3e-2, f"max abs error {err}"

    print("KERNEL_OK")
</pallas_src>

<mosaic_0001>
module attributes {stable_mosaic.version = 11 : i64} {
  func.func @_convt_leaky_kernel(%arg0: i32, %arg1: i32, %arg2: memref<1x480x256xf32, #tpu.memory_space<vmem>>, %arg3: memref<32x480xbf16, #tpu.memory_space<vmem>>, %arg4: memref<32x1xf32, #tpu.memory_space<vmem>>, %arg5: memref<1x32x256xf32, #tpu.memory_space<vmem>>) attributes {dimension_semantics = [#tpu.dimension_semantics<parallel>, #tpu.dimension_semantics<parallel>], iteration_bounds = array<i64: 2, 1>, scalar_prefetch = 0 : i64, scratch_operands = 0 : i64, tpu.core_type = #tpu.core_type<tc>, window_params = [{transform_indices = @transform_0, window_bounds = array<i64: 1, 480, 256>}, {pipeline_mode = #tpu.pipeline_mode<synchronous>, transform_indices = @transform_1, window_bounds = array<i64: 32, 480>}, {pipeline_mode = #tpu.pipeline_mode<synchronous>, transform_indices = @transform_2, window_bounds = array<i64: 32, 1>}, {transform_indices = @transform_3, window_bounds = array<i64: 1, 32, 256>}]} {
    %c0 = arith.constant 0 : index
    %c0_0 = arith.constant 0 : index
    %c0_1 = arith.constant 0 : index
    %0 = vector.load %arg2[%c0, %c0_0, %c0_1] : memref<1x480x256xf32, #tpu.memory_space<vmem>>, vector<1x480x256xf32>
    %1 = vector.shape_cast %0 : vector<1x480x256xf32> to vector<480x256xf32>
    %2 = arith.truncf %1 : vector<480x256xf32> to vector<480x256xbf16>
    %c0_2 = arith.constant 0 : index
    %c0_3 = arith.constant 0 : index
    %3 = vector.load %arg3[%c0_2, %c0_3] : memref<32x480xbf16, #tpu.memory_space<vmem>>, vector<32x480xbf16>
    %cst = arith.constant dense<0.000000e+00> : vector<32x256xf32>
    %4 = tpu.matmul %3, %2, %cst {dimension_numbers = #tpu.dot_dimension_numbers<[1], [0], [0], [1], [0, 0, 1, 1], [], []>} : vector<32x480xbf16>, vector<480x256xbf16>, vector<32x256xf32> -> vector<32x256xf32>
    %c0_4 = arith.constant 0 : index
    %c0_5 = arith.constant 0 : index
    %5 = vector.load %arg4[%c0_4, %c0_5] : memref<32x1xf32, #tpu.memory_space<vmem>>, vector<32x1xf32>
    %6 = vector.broadcast %5 : vector<32x1xf32> to vector<32x256xf32>
    %7 = arith.addf %4, %6 : vector<32x256xf32>
    %cst_6 = arith.constant 0.000000e+00 : f32
    %8 = vector.broadcast %cst_6 : f32 to vector<32x256xf32>
    %9 = arith.cmpf ogt, %7, %8 : vector<32x256xf32>
    %cst_7 = arith.constant 5.000000e-01 : f32
    %10 = vector.broadcast %cst_7 : f32 to vector<32x256xf32>
    %11 = arith.mulf %7, %10 : vector<32x256xf32>
    %12 = arith.select %9, %7, %11 : vector<32x256xi1>, vector<32x256xf32>
    %c0_8 = arith.constant 0 : index
    %c0_9 = arith.constant 0 : index
    %c0_10 = arith.constant 0 : index
    %13 = vector.load %arg5[%c0_8, %c0_9, %c0_10] : memref<1x32x256xf32, #tpu.memory_space<vmem>>, vector<1x32x256xf32>
    %14 = vector.shape_cast %13 : vector<1x32x256xf32> to vector<32x256xf32>
    %15 = vector.shape_cast %12 : vector<32x256xf32> to vector<1x32x256xf32>
    tpu.vector_store %arg5[%c0_8, %c0_9, %c0_10], %15 {strides = array<i32>} : memref<1x32x256xf32, #tpu.memory_space<vmem>>, vector<1x32x256xf32>,
    return
  }
  func.func @transform_0(%arg0: i32, %arg1: i32) -> (i32, i32, i32) {
    %c0_i32 = arith.constant 0 : i32
    %c0_i32_0 = arith.constant 0 : i32
    return %arg0, %c0_i32, %arg1 : i32, i32, i32
  }
  func.func @transform_1(%arg0: i32, %arg1: i32) -> (i32, i32) {
    %c0_i32 = arith.constant 0 : i32
    %c0_i32_0 = arith.constant 0 : i32
    %c0_i32_1 = arith.constant 0 : i32
    return %c0_i32, %c0_i32_0 : i32, i32
  }
  func.func @transform_2(%arg0: i32, %arg1: i32) -> (i32, i32) {
    %c0_i32 = arith.constant 0 : i32
    %c0_i32_0 = arith.constant 0 : i32
    %c0_i32_1 = arith.constant 0 : i32
    return %c0_i32, %c0_i32_0 : i32, i32
  }
  func.func @transform_3(%arg0: i32, %arg1: i32) -> (i32, i32, i32) {
    %c0_i32 = arith.constant 0 : i32
    %c0_i32_0 = arith.constant 0 : i32
    return %arg0, %c0_i32, %arg1 : i32, i32, i32
  }
}

</mosaic_0001>

<bundles_post_ra>
// kernel: conv_transpose_leaky.1
= control target key start
LH: loop header
LB: loop body
LE: loop exit
PB: predicated region body
PF: predicated region fallthrough
CT: control target
= control target key end

     0   :  { %s867_s12 = smov 0   ;;  %s869_s13 = smov 0   ;;  %s1120_s0 = inlined_call_operand.vmem [shape: f32[2,480,256], index: 0, kind: input, shape index: {}]   ;;  %s1121_s1 = inlined_call_operand.vmem [shape: bf16[32,480], index: 1, kind: input, shape index: {}]   ;;  %s1122_s2 = inlined_call_operand.vmem [shape: f32[32,1], index: 2, kind: input, shape index: {}]   ;;  %s1123_s3 = inlined_call_operand.vmem [shape: f32[2,32,256], index: 3, kind: output, shape index: {}]  }
   0x1   :  { %s871_s14 = smov 0  }
   0x2 LB: > { %s25_s15 = sadd.s32 1, %s840_s13  ;;  %p743_p0 = scmp.ge.s32.totalorder %s844_s14, 1  ;;  %s844_s14 = sphi %s871_s14, %s13_s14   ;;  %s840_s13 = sphi %s869_s13, %s1125_s13   ;;  %s836_s12 = sphi %s867_s12, %s1124_s12  }
   0x3   : > { %p27_p1 = scmp.ge.s32.totalorder %s25_s15, 2  ;;  %p158_p2 = scmp.lt.s32.totalorder %s844_s14, 3 }
   0x5   : > { %s1127_s15 = smov (%p27_p1, %s25_s15), 0  ;;  %p159_p3 = pnand %p743_p0, %p158_p2 }
   0x6   : > { %p191_p4 = scmp.lt.s32.totalorder (!%p159_p3), %s836_s12, 1 }
   0x7   : > { %162 = sbr.rel (%p159_p3) target bundleno = 246 (0xf6), region = 32 }
   0xc   : > { %s1129_s12 = smov (!%p191_p4, %s836_s12), 1  ;;  %v846_v54 = vmov 0   ;;  %vm461_vm0 = vcmask 785408  }
   0xd   : > { %s794_s16 = smul.u32 960, %s1129_s12  ;;  %820 = vset.pattern.permute.xlu0 %v846_v54  ;;  %821 = vset.pattern.permute.xlu1 %v846_v54 }
   0xf   : > { %s891_s19 = scalar_lea.vmem %s1120_s0, %s794_s16 }
  0x10   : > { %v239_v0 = vld [vmem:[%s891_s19 + $0xe0] sm:$0xff]  ;;  %v241_v1 = vld [vmem:[%s891_s19 + $0xf0] sm:$0xff] }
  0x11   : > { %v271_v2 = vld [vmem:[%s891_s19 + $0x1e0] sm:$0xff]  ;;  %v345_v3 = vpack.c.bf16 %v241_v1, %v239_v0  ;;  %v273_v4 = vld [vmem:[%s891_s19 + $0x1f0] sm:$0xff] }
  0x12   : > { %v303_v5 = vld [vmem:[%s891_s19 + $0x2e0] sm:$0xff]  ;;  %v305_v6 = vld [vmem:[%s891_s19 + $0x2f0] sm:$0xff]  ;;  %v361_v7 = vpack.c.bf16 %v273_v4, %v271_v2 }
  0x13   : > { %v377_v8 = vpack.c.bf16 %v305_v6, %v303_v5  ;;  %v327_v9 = vld [vmem:[%s891_s19 + $0x3a0] sm:$0xff]  ;;  %v329_v10 = vld [vmem:[%s891_s19 + $0x3b0] sm:$0xff]  ;;  %468 = vmatpush.bf16.msra.mxu0 %v345_v3  ;;  %v787_v6 = vld [vmem:[%s1121_s1 + $0xc] sm:$0xf] }
  0x14   : > { %v235_v11 = vld [vmem:[%s891_s19 + $0xc0] sm:$0xff]  ;;  %v389_v12 = vpack.c.bf16 %v329_v10, %v327_v9  ;;  %v237_v13 = vld [vmem:[%s891_s19 + $0xd0] sm:$0xff]  ;;  %487 = vmatpush.bf16.msra.mxu1 %v361_v7  ;;  %v240_v7 = vld [vmem:[%s891_s19 + $0xe8] sm:$0xff] }
  0x15   : > { %v267_v14 = vld [vmem:[%s891_s19 + $0x1c0] sm:$0xff]  ;;  %v269_v15 = vld [vmem:[%s891_s19 + $0x1d0] sm:$0xff]  ;;  %506 = vmatpush.bf16.msra.mxu2 %v377_v8  ;;  %v343_v16 = vpack.c.bf16 %v237_v13, %v235_v11  ;;  %v242_v8 = vld [vmem:[%s891_s19 + $0xf8] sm:$0xff] }
  0x16   : > { %v359_v17 = vpack.c.bf16 %v269_v15, %v267_v14  ;;  %v299_v18 = vld [vmem:[%s891_s19 + $0x2c0] sm:$0xff]  ;;  %v301_v19 = vld [vmem:[%s891_s19 + $0x2d0] sm:$0xff]  ;;  %527 = vmatpush.bf16.msra.mxu3 %v389_v12  ;;  %v759_v11 = vld [vmem:[%s1121_s1 + $0x18] sm:$0xf0] }
  0x17   : > { %v323_v20 = vld [vmem:[%s891_s19 + $0x380] sm:$0xff]  ;;  %v375_v21 = vpack.c.bf16 %v301_v19, %v299_v18  ;;  %v325_v22 = vld [vmem:[%s891_s19 + $0x390] sm:$0xff]  ;;  %469 = vmatpush.bf16.msra.mxu0 %v343_v16  ;;  %v346_v19 = vpack.c.bf16 %v242_v8, %v240_v7  ;;  %v298_v7 = vld [vmem:[%s891_s19 + $0x2b8] sm:$0xff] }
  0x18   : > { %v231_v23 = vld [vmem:[%s891_s19 + $0xa0] sm:$0xff]  ;;  %v233_v24 = vld [vmem:[%s891_s19 + $0xb0] sm:$0xff]  ;;  %v387_v25 = vpack.c.bf16 %v325_v22, %v323_v20  ;;  %488 = vmatpush.bf16.msra.mxu1 %v359_v17 }
  0x19   : > { %v263_v26 = vld [vmem:[%s891_s19 + $0x1a0] sm:$0xff]  ;;  %v265_v27 = vld [vmem:[%s891_s19 + $0x1b0] sm:$0xff]  ;;  %v341_v29 = vpack.c.bf16 %v233_v24, %v231_v23  ;;  %507 = vmatpush.bf16.msra.mxu2 %v375_v21  ;;  %v236_v24 = vld [vmem:[%s891_s19 + $0xc8] sm:$0xff] }
  0x1a   : > { %v295_v28 = vld [vmem:[%s891_s19 + $0x2a0] sm:$0xff]  ;;  %v297_v30 = vld [vmem:[%s891_s19 + $0x2b0] sm:$0xff]  ;;  %v357_v33 = vpack.c.bf16 %v265_v27, %v263_v26  ;;  %528 = vmatpush.bf16.msra.mxu3 %v387_v25  ;;  %v238_v25 = vld [vmem:[%s891_s19 + $0xd8] sm:$0xff]  ;;  %v960_v26 = vor.u32 %v787_v6, %v759_v11 }
  0x1b   : > { %v319_v31 = vld [vmem:[%s891_s19 + $0x360] sm:$0xff]  ;;  %v321_v32 = vld [vmem:[%s891_s19 + $0x370] sm:$0xff]  ;;  %v373_v34 = vpack.c.bf16 %v297_v30, %v295_v28  ;;  %470 = vmatpush.bf16.msra.mxu0 %v341_v29  ;;  %v296_v6 = vld [vmem:[%s891_s19 + $0x2a8] sm:$0xff] }
  0x1c   : > { %v227_v35 = vld [vmem:[%s891_s19 + $0x80] sm:$0xff]  ;;  %v229_v36 = vld [vmem:[%s891_s19 + $0x90] sm:$0xff]  ;;  %v385_v38 = vpack.c.bf16 %v321_v32, %v319_v31  ;;  %489 = vmatpush.bf16.msra.mxu1 %v357_v33  ;;  %v322_v11 = vld [vmem:[%s891_s19 + $0x378] sm:$0xff] }
  0x1d   : > { %v259_v37 = vld [vmem:[%s891_s19 + $0x180] sm:$0xff]  ;;  %v261_v39 = vld [vmem:[%s891_s19 + $0x190] sm:$0xff]  ;;  %v339_v44 = vpack.c.bf16 %v229_v36, %v227_v35  ;;  %508 = vmatpush.bf16.msra.mxu2 %v373_v34  ;;  %v272_v34 = vld [vmem:[%s891_s19 + $0x1e8] sm:$0xff]  ;;  %v344_v36 = vpack.c.bf16 %v238_v25, %v236_v24 }
  0x1e   : > { %v291_v40 = vld [vmem:[%s891_s19 + $0x280] sm:$0xff]  ;;  %v293_v41 = vld [vmem:[%s891_s19 + $0x290] sm:$0xff]  ;;  %v355_v45 = vpack.c.bf16 %v261_v39, %v259_v37  ;;  %529 = vmatpush.bf16.msra.mxu3 %v385_v38  ;;  %v274_v35 = vld [vmem:[%s891_s19 + $0x1f8] sm:$0xff] }
  0x1f   : > { %v315_v42 = vld [vmem:[%s891_s19 + $0x340] sm:$0xff]  ;;  %v317_v43 = vld [vmem:[%s891_s19 + $0x350] sm:$0xff]  ;;  %v371_v46 = vpack.c.bf16 %v293_v41, %v291_v40  ;;  %471 = vmatpush.bf16.msra.mxu0 %v339_v44  ;;  %v304_v38 = vld [vmem:[%s891_s19 + $0x2e8] sm:$0xff] }
  0x20   : > { %v223_v47 = vld [vmem:[%s891_s19 + $0x60] sm:$0xff]  ;;  %v225_v48 = vld [vmem:[%s891_s19 + $0x70] sm:$0xff]  ;;  %v383_v50 = vpack.c.bf16 %v317_v43, %v315_v42  ;;  %490 = vmatpush.bf16.msra.mxu1 %v355_v45  ;;  %v306_v39 = vld [vmem:[%s891_s19 + $0x2f8] sm:$0xff] }
  0x21   : > { %v255_v49 = vld [vmem:[%s891_s19 + $0x160] sm:$0xff]  ;;  %v257_v51 = vld [vmem:[%s891_s19 + $0x170] sm:$0xff]  ;;  %v337_v57 = vpack.c.bf16 %v225_v48, %v223_v47  ;;  %509 = vmatpush.bf16.msra.mxu2 %v371_v46  ;;  %v328_v42 = vld [vmem:[%s891_s19 + $0x3a8] sm:$0xff]  ;;  %v362_v48 = vpack.c.bf16 %v274_v35, %v272_v34 }
  0x22   : > { %v287_v52 = vld [vmem:[%s891_s19 + $0x260] sm:$0xff]  ;;  %v289_v53 = vld [vmem:[%s891_s19 + $0x270] sm:$0xff]  ;;  %v353_v58 = vpack.c.bf16 %v257_v51, %v255_v49  ;;  %530 = vmatpush.bf16.msra.mxu3 %v383_v50  ;;  %v330_v43 = vld [vmem:[%s891_s19 + $0x3b8] sm:$0xff]  ;;  %v378_v51 = vpack.c.bf16 %v306_v39, %v304_v38 }
  0x23   : > { %v311_v55 = vld [vmem:[%s891_s19 + $0x320] sm:$0xff]  ;;  %v313_v56 = vld [vmem:[%s891_s19 + $0x330] sm:$0xff]  ;;  %v369_v59 = vpack.c.bf16 %v289_v53, %v287_v52  ;;  %472 = vmatpush.bf16.msra.mxu0 %v337_v57  ;;  %v757_v45 = vld [vmem:[%s1121_s1 + $0x8] sm:$0xf] }
  0x24   : > { %v219_v60 = vld [vmem:[%s891_s19 + $0x40] sm:$0xff]  ;;  %v221_v61 = vld [vmem:[%s891_s19 + $0x50] sm:$0xff]  ;;  %v381_v63 = vpack.c.bf16 %v313_v56, %v311_v55  ;;  %491 = vmatpush.bf16.msra.mxu1 %v353_v58  ;;  %v232_v46 = vld [vmem:[%s891_s19 + $0xa8] sm:$0xff]  ;;  %v390_v55 = vpack.c.bf16 %v330_v43, %v328_v42 }
  0x25   : > { %v251_v62 = vld [vmem:[%s891_s19 + $0x140] sm:$0xff]  ;;  %v253_v0 = vld [vmem:[%s891_s19 + $0x150] sm:$0xff]  ;;  %v335_v5 = vpack.c.bf16 %v221_v61, %v219_v60  ;;  %510 = vmatpush.bf16.msra.mxu2 %v369_v59  ;;  %v234_v47 = vld [vmem:[%s891_s19 + $0xb8] sm:$0xff] }
  0x26   : > { %v283_v1 = vld [vmem:[%s891_s19 + $0x240] sm:$0xff]  ;;  %v285_v2 = vld [vmem:[%s891_s19 + $0x250] sm:$0xff]  ;;  %v351_v9 = vpack.c.bf16 %v253_v0, %v251_v62  ;;  %531 = vmatpush.bf16.msra.mxu3 %v381_v63  ;;  %v789_v50 = vld [vmem:[%s1121_s1 + $0x14] sm:$0xf0]  ;;  %v342_v59 = vpack.c.bf16 %v234_v47, %v232_v46 }
  0x27   : > { %v307_v3 = vld [vmem:[%s891_s19 + $0x300] sm:$0xff]  ;;  %v309_v4 = vld [vmem:[%s891_s19 + $0x310] sm:$0xff]  ;;  %v367_v10 = vpack.c.bf16 %v285_v2, %v283_v1  ;;  %473 = vmatpush.bf16.msra.mxu0 %v335_v5  ;;  %v268_v52 = vld [vmem:[%s891_s19 + $0x1c8] sm:$0xff]  ;;  %v1003_v62 = vor.u32 %v789_v50, %v757_v45 }
  0x28   : > { %v215_v12 = vld [vmem:[%s891_s19 + $0x20] sm:$0xff]  ;;  %v217_v13 = vld [vmem:[%s891_s19 + $0x30] sm:$0xff]  ;;  %v379_v14 = vpack.c.bf16 %v309_v4, %v307_v3  ;;  %492 = vmatpush.bf16.msra.mxu1 %v351_v9  ;;  %v270_v53 = vld [vmem:[%s891_s19 + $0x1d8] sm:$0xff] }
  0x29   : > { %v247_v15 = vld [vmem:[%s891_s19 + $0x120] sm:$0xff]  ;;  %v249_v16 = vld [vmem:[%s891_s19 + $0x130] sm:$0xff]  ;;  %v333_v22 = vpack.c.bf16 %v217_v13, %v215_v12  ;;  %511 = vmatpush.bf16.msra.mxu2 %v367_v10  ;;  %v300_v56 = vld [vmem:[%s891_s19 + $0x2c8] sm:$0xff]  ;;  %v360_v1 = vpack.c.bf16 %v270_v53, %v268_v52 }
  0x2a   : > { %v279_v17 = vld [vmem:[%s891_s19 + $0x220] sm:$0xff]  ;;  %v281_v18 = vld [vmem:[%s891_s19 + $0x230] sm:$0xff]  ;;  %v349_v27 = vpack.c.bf16 %v249_v16, %v247_v15  ;;  %532 = vmatpush.bf16.msra.mxu3 %v379_v14  ;;  %v302_v57 = vld [vmem:[%s891_s19 + $0x2d8] sm:$0xff] }
  0x2b   : > { %v211_v20 = vld [vmem:[%s891_s19] sm:$0xff]  ;;  %v213_v21 = vld [vmem:[%s891_s19 + $0x10] sm:$0xff]  ;;  %v365_v31 = vpack.c.bf16 %v281_v18, %v279_v17  ;;  %474 = vmatpush.bf16.msra.mxu0 %v333_v22  ;;  %v324_v60 = vld [vmem:[%s891_s19 + $0x388] sm:$0xff]  ;;  %v376_v2 = vpack.c.bf16 %v302_v57, %v300_v56  ;;  %v374_v17 = vpack.c.bf16 %v298_v7, %v296_v6 }
  0x2c   : > { %v243_v23 = vld [vmem:[%s891_s19 + $0x100] sm:$0xff]  ;;  %v245_v28 = vld [vmem:[%s891_s19 + $0x110] sm:$0xff]  ;;  %v331_v40 = vpack.c.bf16 %v213_v21, %v211_v20  ;;  %493 = vmatpush.bf16.msra.mxu1 %v349_v27  ;;  %v326_v61 = vld [vmem:[%s891_s19 + $0x398] sm:$0xff] }
  0x2d   : > { %v275_v29 = vld [vmem:[%s891_s19 + $0x200] sm:$0xff]  ;;  %v277_v30 = vld [vmem:[%s891_s19 + $0x210] sm:$0xff]  ;;  %779 = vmatmul.msk.bf16.vlgmr.msra.gmra.mxu3 %vm461_vm0, %v960_v26  ;;  %v347_v44 = vpack.c.bf16 %v245_v28, %v243_v23  ;;  %512 = vmatpush.bf16.msra.mxu2 %v365_v31  ;;  %v228_v63 = vld [vmem:[%s891_s19 + $0x88] sm:$0xff]  ;;  %v388_v5 = vpack.c.bf16 %v326_v61, %v324_v60 }
  0x2e   : > { %v749_v32 = vld [vmem:[%s1121_s1] sm:$0xf]  ;;  %v788_v33 = vld [vmem:[%s1121_s1 + $0xc] sm:$0xf0]  ;;  %544 = vmatpush.bf16.msrb.mxu3 %v346_v19  ;;  %v786_v37 = vld [vmem:[%s1121_s1 + $0x4] sm:$0xf]  ;;  %v363_v49 = vpack.c.bf16 %v277_v30, %v275_v29 }
  0x2f   : > { %v751_v41 = vld [vmem:[%s1121_s1 + $0x10] sm:$0xf0]  ;;  %v995_v54 = vor.u32 %v788_v33, %v749_v32  ;;  %475 = vmatpush.bf16.msra.mxu0 %v331_v40  ;;  %v230_v0 = vld [vmem:[%s891_s19 + $0x98] sm:$0xff]  ;;  %v264_v3 = vld [vmem:[%s891_s19 + $0x1a8] sm:$0xff] }
  0x30   : > { %v999_v58 = vor.u32 %v786_v37, %v751_v41  ;;  %494 = vmatpush.bf16.msra.mxu1 %v347_v44  ;;  %v266_v4 = vld [vmem:[%s891_s19 + $0x1b8] sm:$0xff]  ;;  %v399_v8 = vld [vmem:[%s1122_s2] sm:$0xff]  ;;  %v340_v9 = vpack.c.bf16 %v230_v0, %v228_v63  ;;  %v320_v10 = vld [vmem:[%s891_s19 + $0x368] sm:$0xff] }
  0x31   : > { %513 = vmatpush.bf16.msra.mxu2 %v363_v49  ;;  %v791_v12 = vld [vmem:[%s1121_s1 + $0x2c] sm:$0xf]  ;;  %v226_v14 = vld [vmem:[%s891_s19 + $0x78] sm:$0xff]  ;;  %v358_v15 = vpack.c.bf16 %v266_v4, %v264_v3  ;;  %405 = vperm.xlu0 %820, %v399_v8   ;;  %v386_v20 = vpack.c.bf16 %v322_v11, %v320_v10  ;;  %v765_v32 = vld [vmem:[%s1121_s1 + $0x20] sm:$0xf] }
  0x32   : > { %545 = vmatpush.bf16.msrb.mxu3 %v344_v36  ;;  %476 = vmatmul.bf16.vlgmr.msra.gmra.mxu0 %v995_v54  ;;  %v224_v13 = vld [vmem:[%s891_s19 + $0x68] sm:$0xff]  ;;  %v775_v16 = vld [vmem:[%s1121_s1 + $0x38] sm:$0xf0]  ;;  %v792_v33 = vld [vmem:[%s1121_s1 + $0x2c] sm:$0xf0] }
  0x33   : > { %563 = vmatpush.bf16.msrb.mxu0 %v362_v48  ;;  %495 = vmatmul.bf16.vlgmr.msra.gmra.mxu1 %v999_v58  ;;  %v260_v18 = vld [vmem:[%s891_s19 + $0x188] sm:$0xff]  ;;  %v262_v19 = vld [vmem:[%s891_s19 + $0x198] sm:$0xff]  ;;  %v338_v23 = vpack.c.bf16 %v226_v14, %v224_v13  ;;  %v1033_v27 = vor.u32 %v791_v12, %v775_v16  ;;  %v790_v36 = vld [vmem:[%s1121_s1 + $0x24] sm:$0xf] }
  0x34   : > { %582 = vmatpush.bf16.msrb.mxu1 %v378_v51  ;;  %514 = vmatmul.bf16.vlgmr.msra.gmra.mxu2 %v1003_v62  ;;  %v292_v21 = vld [vmem:[%s891_s19 + $0x288] sm:$0xff]  ;;  %v294_v22 = vld [vmem:[%s891_s19 + $0x298] sm:$0xff]  ;;  %v356_v30 = vpack.c.bf16 %v262_v19, %v260_v18  ;;  %v767_v37 = vld [vmem:[%s1121_s1 + $0x30] sm:$0xf0] }
  0x35   : > { %603 = vmatpush.bf16.msrb.mxu2 %v390_v55  ;;  %v316_v24 = vld [vmem:[%s891_s19 + $0x348] sm:$0xff]  ;;  %v318_v25 = vld [vmem:[%s891_s19 + $0x358] sm:$0xff]  ;;  %v372_v31 = vpack.c.bf16 %v294_v22, %v292_v21  ;;  %v401_v45 = vld [vmem:[%s1122_s2 + $0x10] sm:$0xff]  ;;  %v766_v55 = vor.u32 %v792_v33, %v765_v32  ;;  %v770_v60 = vor.u32 %v790_v36, %v767_v37 }
  0x36   : > { %546 = vmatpush.bf16.msrb.mxu3 %v342_v59  ;;  %v220_v28 = vld [vmem:[%s891_s19 + $0x48] sm:$0xff]  ;;  %v222_v29 = vld [vmem:[%s891_s19 + $0x58] sm:$0xff]  ;;  %v384_v38 = vpack.c.bf16 %v318_v25, %v316_v24  ;;  %415 = vperm.xlu1 %821, %v401_v45  }
  0x37   : > { %564 = vmatpush.bf16.msrb.mxu0 %v360_v1  ;;  %v256_v34 = vld [vmem:[%s891_s19 + $0x168] sm:$0xff]  ;;  %v258_v35 = vld [vmem:[%s891_s19 + $0x178] sm:$0xff]  ;;  %v336_v42 = vpack.c.bf16 %v222_v29, %v220_v28 }
  0x38   : > { %583 = vmatpush.bf16.msrb.mxu1 %v376_v2  ;;  %v288_v39 = vld [vmem:[%s891_s19 + $0x268] sm:$0xff]  ;;  %v290_v40 = vld [vmem:[%s891_s19 + $0x278] sm:$0xff]  ;;  %v354_v49 = vpack.c.bf16 %v258_v35, %v256_v34 }
  0x39   : > { %604 = vmatpush.bf16.msrb.mxu2 %v388_v5  ;;  %v400_v41 = vld [vmem:[%s1122_s2 + $0x8] sm:$0xff]  ;;  %v314_v44 = vld [vmem:[%s891_s19 + $0x338] sm:$0xff]  ;;  %v370_v51 = vpack.c.bf16 %v290_v40, %v288_v39 }
  0x3a   : > { %547 = vmatpush.bf16.msrb.mxu3 %v340_v9  ;;  %v312_v43 = vld [vmem:[%s891_s19 + $0x328] sm:$0xff]  ;;  %v218_v48 = vld [vmem:[%s891_s19 + $0x38] sm:$0xff]  ;;  %410 = vperm.xlu0 %820, %v400_v41  }
  0x3b   : > { %565 = vmatpush.bf16.msrb.mxu0 %v358_v15  ;;  %v773_v46 = vld [vmem:[%s1121_s1 + $0x28] sm:$0xf]  ;;  %v793_v50 = vld [vmem:[%s1121_s1 + $0x34] sm:$0xf0]  ;;  %v382_v59 = vpack.c.bf16 %v314_v44, %v312_v43 }
  0x3c   : > { %584 = vmatpush.bf16.msrb.mxu1 %v374_v17  ;;  %v216_v47 = vld [vmem:[%s891_s19 + $0x28] sm:$0xff]  ;;  %v254_v53 = vld [vmem:[%s891_s19 + $0x158] sm:$0xff]  ;;  %v774_v1 = vor.u32 %v793_v50, %v773_v46 }
  0x3d   : > { %605 = vmatpush.bf16.msrb.mxu2 %v386_v20  ;;  %780 = vmatmul.msk.bf16.gmra.mxu3 %vm461_vm0, %v1033_v27  ;;  %v252_v52 = vld [vmem:[%s891_s19 + $0x148] sm:$0xff]  ;;  %v286_v57 = vld [vmem:[%s891_s19 + $0x258] sm:$0xff]  ;;  %v334_v61 = vpack.c.bf16 %v218_v48, %v216_v47 }
  0x3e   : > { %548 = vmatpush.bf16.msrb.mxu3 %v338_v23  ;;  %v284_v56 = vld [vmem:[%s891_s19 + $0x248] sm:$0xff]  ;;  %v310_v0 = vld [vmem:[%s891_s19 + $0x318] sm:$0xff]  ;;  %v352_v4 = vpack.c.bf16 %v254_v53, %v252_v52 }
  0x3f   : > { %566 = vmatpush.bf16.msrb.mxu0 %v356_v30  ;;  %v308_v63 = vld [vmem:[%s891_s19 + $0x308] sm:$0xff]  ;;  %v214_v3 = vld [vmem:[%s891_s19 + $0x18] sm:$0xff]  ;;  %v368_v5 = vpack.c.bf16 %v286_v57, %v284_v56 }
  0x40   : > { %585 = vmatpush.bf16.msrb.mxu1 %v372_v31  ;;  %v212_v2 = vld [vmem:[%s891_s19 + $0x8] sm:$0xff]  ;;  %v250_v7 = vld [vmem:[%s891_s19 + $0x138] sm:$0xff]  ;;  %v380_v10 = vpack.c.bf16 %v310_v0, %v308_v63 }
  0x41   : > { %606 = vmatpush.bf16.msrb.mxu2 %v384_v38  ;;  %v248_v6 = vld [vmem:[%s891_s19 + $0x128] sm:$0xff]  ;;  %v282_v9 = vld [vmem:[%s891_s19 + $0x238] sm:$0xff]  ;;  %v332_v11 = vpack.c.bf16 %v214_v3, %v212_v2 }
  0x42   : > { %549 = vmatpush.bf16.msrb.mxu3 %v336_v42  ;;  %481 = vmatmul.bf16.gmra.mxu0 %v766_v55  ;;  %v280_v8 = vld [vmem:[%s891_s19 + $0x228] sm:$0xff]  ;;  %v402_v12 = vld [vmem:[%s1122_s2 + $0x18] sm:$0xff]  ;;  %v350_v13 = vpack.c.bf16 %v250_v7, %v248_v6 }
  0x43   : > { %567 = vmatpush.bf16.msrb.mxu0 %v354_v49  ;;  %500 = vmatmul.bf16.gmra.mxu1 %v770_v60  ;;  %v366_v14 = vpack.c.bf16 %v282_v9, %v280_v8  ;;  %v244_v15 = vld [vmem:[%s891_s19 + $0x108] sm:$0xff]  ;;  %v246_v16 = vld [vmem:[%s891_s19 + $0x118] sm:$0xff] }
  0x44   : > { %586 = vmatpush.bf16.msrb.mxu1 %v370_v51  ;;  %519 = vmatmul.bf16.gmra.mxu2 %v774_v1  ;;  %v276_v17 = vld [vmem:[%s891_s19 + $0x208] sm:$0xff]  ;;  %v278_v18 = vld [vmem:[%s891_s19 + $0x218] sm:$0xff]  ;;  %v348_v19 = vpack.c.bf16 %v246_v16, %v244_v15  ;;  %s785_s19 = sshll.u32 %s1129_s12, 6 }
  0x45   : > { %607 = vmatpush.bf16.msrb.mxu2 %v382_v59  ;;  %420 = vperm.xlu1 %821, %v402_v12   ;;  %v364_v20 = vpack.c.bf16 %v278_v18, %v276_v17  ;;  %s1101_s17 = scalar_lea.vmem %s1123_s3, %s785_s19 }
  0x46   : > { %550 = vmatpush.bf16.msrb.mxu3 %v334_v61 }
  0x47   : > { %568 = vmatpush.bf16.msrb.mxu0 %v352_v4 }
  0x48   : > { %587 = vmatpush.bf16.msrb.mxu1 %v368_v5 }
  0x49   : > { %608 = vmatpush.bf16.msrb.mxu2 %v380_v10 }
  0x4a   : > { %551 = vmatpush.bf16.msrb.mxu3 %v332_v11 }
  0x4b   : > { %569 = vmatpush.bf16.msrb.mxu0 %v350_v13 }
  0x4c   : > { %588 = vmatpush.bf16.msrb.mxu1 %v366_v14 }
  0x4d   : > { %552 = vmatmul.bf16.vlgmr.msrb.gmra.mxu3 %v995_v54 }
  0x4f   : > { %570 = vmatpush.bf16.msrb.mxu0 %v348_v19 }
  0x50   : > { %589 = vmatpush.bf16.msrb.mxu1 %v364_v20 }
  0x52   : > { %571 = vmatmul.bf16.vlgmr.msrb.gmra.mxu0 %v999_v58 }
  0x53   : > { %590 = vmatmul.bf16.vlgmr.msrb.gmra.mxu1 %v1003_v62 }
  0x54   : > { %781 = vmatmul.msk.bf16.vlgmr.msrb.gmra.mxu2 %vm461_vm0, %v960_v26 }
  0x5d   : > { %557 = vmatmul.bf16.gmra.mxu3 %v766_v55 }
  0x62   : > { %576 = vmatmul.bf16.gmra.mxu0 %v770_v60 }
  0x63   : > { %595 = vmatmul.bf16.gmra.mxu1 %v774_v1 }
  0x64   : > { %782 = vmatmul.msk.bf16.gmra.mxu2 %vm461_vm0, %v1033_v27 }
  0xa3   : > { %v406_v21 = vpop.permute.xlu0 %405 }
  0xa8   : > { %v416_v33 = vpop.permute.xlu1 %415 }
  0xac   : > { %v411_v28 = vpop.permute.xlu0 %410 }
  0xaf   : > { %v477_v23 = vpop.f32.mrf.mxu0 }
  0xb0   : > { %v534_v22 = vpop.f32.mrf.mxu3  ;;  %v478_v54 = vadd.f32 %v477_v23, %v406_v21  ;;  %v496_v24 = vpop.f32.mrf.mxu1 }
  0xb2   : > { %v497_v25 = vadd.f32 %v496_v24, %v478_v54 }
  0xb7   : > { %v515_v58 = vpop.f32.mrf.mxu2  ;;  %v479_v30 = vpop.f32.mrf.mxu0 }
  0xb8   : > { %v536_v29 = vpop.f32.mrf.mxu3  ;;  %v516_v62 = vadd.f32 %v515_v58, %v497_v25  ;;  %v498_v31 = vpop.f32.mrf.mxu1  ;;  %v480_v32 = vadd.f32 %v479_v30, %v411_v28 }
  0xb9   : > { %v421_v46 = vpop.permute.xlu1 %420 }
  0xba   : > { %v535_v26 = vadd.f32 %v534_v22, %v516_v62  ;;  %v499_v35 = vadd.f32 %v498_v31, %v480_v32 }
  0xbc   : > { %vm620_vm1 = vcmp.gt.f32.partialorder %v535_v26, 0.0  ;;  %v628_v27 = vmul.f32 0.5, %v535_v26 }
  0xbe   : > { %v636_v34 = vsel %vm620_vm1, %v535_v26, %v628_v27 }
  0xbf   : > { %644 = vst [vmem:[%s1101_s17] sm:$0xff] %v636_v34  ;;  %v517_v36 = vpop.f32.mrf.mxu2  ;;  %v482_v39 = vpop.f32.mrf.mxu0 }
  0xc0   : > { %v539_v37 = vpop.f32.mrf.mxu3  ;;  %v518_v38 = vadd.f32 %v517_v36, %v499_v35  ;;  %v501_v40 = vpop.f32.mrf.mxu1  ;;  %v483_v41 = vadd.f32 %v482_v39, %v416_v33 }
  0xc2   : > { %v537_v42 = vadd.f32 %v536_v29, %v518_v38  ;;  %v502_v44 = vadd.f32 %v501_v40, %v483_v41 }
  0xc4   : > { %vm622_vm2 = vcmp.gt.f32.partialorder %v537_v42, 0.0  ;;  %v630_v43 = vmul.f32 0.5, %v537_v42 }
  0xc6   : > { %v638_v45 = vsel %vm622_vm2, %v537_v42, %v630_v43 }
  0xc7   : > { %646 = vst [vmem:[%s1101_s17 + $0x10] sm:$0xff] %v638_v45  ;;  %v520_v47 = vpop.f32.mrf.mxu2  ;;  %v484_v50 = vpop.f32.mrf.mxu0 }
  0xc8   : > { %v541_v48 = vpop.f32.mrf.mxu3  ;;  %v521_v49 = vadd.f32 %v520_v47, %v502_v44  ;;  %v503_v51 = vpop.f32.mrf.mxu1  ;;  %v485_v53 = vadd.f32 %v484_v50, %v421_v46 }
  0xca   : > { %v540_v52 = vadd.f32 %v539_v37, %v521_v49  ;;  %v504_v57 = vadd.f32 %v503_v51, %v485_v53 }
  0xcc   : > { %vm624_vm3 = vcmp.gt.f32.partialorder %v540_v52, 0.0  ;;  %v632_v55 = vmul.f32 0.5, %v540_v52 }
  0xce   : > { %v640_v56 = vsel %vm624_vm3, %v540_v52, %v632_v55 }
  0xcf   : > { %648 = vst [vmem:[%s1101_s17 + $0x20] sm:$0xff] %v640_v56  ;;  %v522_v59 = vpop.f32.mrf.mxu2  ;;  %v572_v0 = vpop.f32.mrf.mxu0 }
  0xd0   : > { %v553_v60 = vpop.f32.mrf.mxu3  ;;  %v523_v61 = vadd.f32 %v522_v59, %v504_v57  ;;  %v591_v1 = vpop.f32.mrf.mxu1 }
  0xd1   : > { %v554_v63 = vadd.f32 %v553_v60, %v406_v21 }
  0xd2   : > { %v542_v2 = vadd.f32 %v541_v48, %v523_v61 }
  0xd3   : > { %v573_v3 = vadd.f32 %v572_v0, %v554_v63 }
  0xd4   : > { %vm626_vm4 = vcmp.gt.f32.partialorder %v542_v2, 0.0  ;;  %v634_v4 = vmul.f32 0.5, %v542_v2 }
  0xd5   : > { %v592_v5 = vadd.f32 %v591_v1, %v573_v3 }
  0xd6   : > { %v642_v6 = vsel %vm626_vm4, %v542_v2, %v634_v4 }
  0xd7   : > { %650 = vst [vmem:[%s1101_s17 + $0x30] sm:$0xff] %v642_v6  ;;  %v610_v8 = vpop.f32.mrf.mxu2  ;;  %v574_v11 = vpop.f32.mrf.mxu0 }
  0xd8   : > { %v555_v7 = vpop.f32.mrf.mxu3  ;;  %v611_v10 = vadd.f32 %v610_v8, %v592_v5  ;;  %v593_v12 = vpop.f32.mrf.mxu1 }
  0xd9   : > { %v556_v9 = vadd.f32 %v555_v7, %v411_v28 }
  0xda   : > { %vm621_vm5 = vcmp.gt.f32.partialorder %v611_v10, 0.0  ;;  %v629_v13 = vmul.f32 0.5, %v611_v10 }
  0xdb   : > { %v575_v14 = vadd.f32 %v574_v11, %v556_v9 }
  0xdc   : > { %v637_v15 = vsel %vm621_vm5, %v611_v10, %v629_v13 }
  0xdd   : > { %645 = vst [vmem:[%s1101_s17 + $0x8] sm:$0xff] %v637_v15  ;;  %v594_v16 = vadd.f32 %v593_v12, %v575_v14 }
  0xdf   : > { %v612_v18 = vpop.f32.mrf.mxu2  ;;  %v577_v21 = vpop.f32.mrf.mxu0 }
  0xe0   : > { %v558_v17 = vpop.f32.mrf.mxu3  ;;  %v613_v20 = vadd.f32 %v612_v18, %v594_v16  ;;  %v596_v54 = vpop.f32.mrf.mxu1 }
  0xe1   : > { %v559_v19 = vadd.f32 %v558_v17, %v416_v33 }
  0xe2   : > { %vm623_vm6 = vcmp.gt.f32.partialorder %v613_v20, 0.0  ;;  %v631_v22 = vmul.f32 0.5, %v613_v20 }
  0xe3   : > { %v578_v23 = vadd.f32 %v577_v21, %v559_v19 }
  0xe4   : > { %v639_v24 = vsel %vm623_vm6, %v613_v20, %v631_v22 }
  0xe5   : > { %v597_v25 = vadd.f32 %v596_v54, %v578_v23  ;;  %647 = vst [vmem:[%s1101_s17 + $0x18] sm:$0xff] %v639_v24 }
  0xe7   : > { %v615_v58 = vpop.f32.mrf.mxu2  ;;  %v579_v30 = vpop.f32.mrf.mxu0 }
  0xe8   : > { %v560_v28 = vpop.f32.mrf.mxu3  ;;  %v616_v62 = vadd.f32 %v615_v58, %v597_v25  ;;  %v598_v27 = vpop.f32.mrf.mxu1 }
  0xe9   : > { %v561_v29 = vadd.f32 %v560_v28, %v421_v46 }
  0xea   : > { %vm625_vm7 = vcmp.gt.f32.partialorder %v616_v62, 0.0  ;;  %v633_v31 = vmul.f32 0.5, %v616_v62 }
  0xeb   : > { %v580_v26 = vadd.f32 %v579_v30, %v561_v29 }
  0xec   : > { %v641_v32 = vsel %vm625_vm7, %v616_v62, %v633_v31 }
  0xed   : > { %649 = vst [vmem:[%s1101_s17 + $0x28] sm:$0xff] %v641_v32  ;;  %v599_v33 = vadd.f32 %v598_v27, %v580_v26 }
  0xef   : > { %v617_v34 = vpop.f32.mrf.mxu2 }
  0xf0   : > { %v618_v35 = vadd.f32 %v617_v34, %v599_v33 }
  0xf2   : > { %vm627_vm8 = vcmp.gt.f32.partialorder %v618_v35, 0.0  ;;  %v635_v36 = vmul.f32 0.5, %v618_v35 }
  0xf4   : > { %v643_v37 = vsel %vm627_vm8, %v618_v35, %v635_v36 }
  0xf5   : > { %651 = vst [vmem:[%s1101_s17 + $0x38] sm:$0xff] %v643_v37 }
  0xf6 PF: > { %s13_s14 = sadd.s32 1, %s844_s14   ;;  %s1124_s12 = smov %s840_s13 }
  0xf7   : > { %p10_p5 = scmp.ge.s32.totalorder %s13_s14, 4   ;;  %s1125_s13 = smov %s1127_s15 }
  0xf9   :  { %12 = sbr.rel (!%p10_p5) target bundleno = 2 (0x2), region = 62 }

</bundles_post_ra>
